<compile_context>
chip_gen: v7x
topology: tpu7x:2x2x1
jax: 0.10.0
libtpu: 0.0.40
codegen_flags: <defaults>
</compile_context>

<pallas_src>
import functools

import jax
import jax.numpy as jnp
from jax.experimental import pallas as pl
from jax.experimental.pallas import tpu as pltpu

IN_FEATURES = 28 * 28          # 784  (multiple of 8; kept un-padded)
H1 = 500
H1_PAD = 512                   # 500 padded up to a multiple of 128
H2 = 256
N_CLASSES = 10


def _cdiv(a, b):
    return -(-a // b)


def _round_up(x, m):
    return _cdiv(x, m) * m


def mnist_mlp_kernel(x_ref, w1_ref, b1_ref, w2_ref, b2_ref, w3_ref, b3_ref, o_ref):
    x = x_ref[...]                                                      # (TM, 784) bf16

    # fc1 + ReLU (bf16 MXU inputs, f32 accumulate / elementwise)
    h1 = jnp.dot(x, w1_ref[...],
                 preferred_element_type=jnp.float32) + b1_ref[...]
    h1 = jnp.maximum(h1, 0.0)                                           # (TM, 512) f32

    # fc2 + ReLU
    h2 = jnp.dot(h1.astype(jnp.bfloat16), w2_ref[...],
                 preferred_element_type=jnp.float32) + b2_ref[...]
    h2 = jnp.maximum(h2, 0.0)                                           # (TM, 256) f32

    # fc3 + softmax over classes (F.softmax default dim=1 for 2-D input)
    logits = jnp.dot(h2.astype(jnp.bfloat16), w3_ref[...],
                     preferred_element_type=jnp.float32) + b3_ref[...]  # (TM, 10)
    m = jnp.max(logits, axis=-1, keepdims=True)
    e = jnp.exp(logits - m)
    # exact normalization: denominator is tiny (TM,1), so an exact divide is ~free
    o_ref[...] = e / jnp.sum(e, axis=-1, keepdims=True)


def prepare_params(params_f32):
    """Pad the hidden dim 500->512 with zeros and cast weights to bf16.

    Weights are stored transposed to (in_features, out_features); biases are
    (1, out_features) rows and stay f32 (elementwise math stays f32).
    The zero padding is exact: w1's extra columns produce h1 columns that are
    ReLU(0 + 0) = 0, and w2's extra (zero) rows multiply exactly those columns.
    """
    w1, b1, w2, b2, w3, b3 = params_f32
    w1p = jnp.zeros((IN_FEATURES, H1_PAD), jnp.float32).at[:, :H1].set(w1)   # (784, 512)
    b1p = jnp.zeros((1, H1_PAD), jnp.float32).at[:, :H1].set(b1)
    w2p = jnp.zeros((H1_PAD, H2), jnp.float32).at[:H1, :].set(w2)            # (512, 256)
    return (
        w1p.astype(jnp.bfloat16), b1p,                       # biases stay f32
        w2p.astype(jnp.bfloat16), b2,
        w3.astype(jnp.bfloat16), b3,
    )


def _choose_tiling(batch, tm_max):
    """Pick (tile, n_steps) with tile % 8 == 0 and tile * n_steps >= batch minimal.

    For non-trivial batches the step count is forced to an even value >= 2 so the
    "parallel" batch axis can shard across v7x's two TensorCores; tile is derived
    from the batch so the last tile is not mostly padding.
    """
    if batch <= 8:
        return 8, 1
    n_steps = max(2, _cdiv(batch, tm_max))
    if n_steps % 2:
        n_steps += 1                       # even split across the 2 TensorCores
    tile = _round_up(_cdiv(batch, n_steps), 8)
    return tile, n_steps


@functools.partial(jax.jit, static_argnames=("tm",))
def mnist_net_forward(x_nchw, prepped_params, tm=1024):
    """x_nchw: (B, 1, 28, 28) float32. Returns (B, 10) softmax probabilities."""
    w1, b1, w2, b2, w3, b3 = prepped_params
    B = x_nchw.shape[0]

    # x.view(-1, 784); cast ONCE to bf16 (MXU input dtype) so the per-step HBM
    # stream is half the bytes of f32.  No K padding (it saved no MXU passes).
    x = x_nchw.reshape(B, IN_FEATURES).astype(jnp.bfloat16)

    tile, n_steps = _choose_tiling(B, tm)
    b_pad = tile * n_steps
    if b_pad != B:
        # single batch pad = one HBM pass; padded rows are sliced off at the end.
        x = jnp.pad(x, ((0, b_pad - B), (0, 0)))

    const = lambda shape: pl.BlockSpec(shape, lambda i: tuple(0 for _ in shape))

    out = pl.pallas_call(
        mnist_mlp_kernel,
        out_shape=jax.ShapeDtypeStruct((b_pad, N_CLASSES), jnp.float32),
        grid_spec=pltpu.PrefetchScalarGridSpec(
            num_scalar_prefetch=0,
            grid=(n_steps,),
            in_specs=[
                pl.BlockSpec((tile, IN_FEATURES), lambda i: (i, 0)),  # x: blocked over batch
                const(w1.shape), const(b1.shape),                     # weights: VMEM-resident
                const(w2.shape), const(b2.shape),
                const(w3.shape), const(b3.shape),
            ],
            out_specs=pl.BlockSpec((tile, N_CLASSES), lambda i: (i, 0)),
        ),
        compiler_params=pltpu.CompilerParams(
            dimension_semantics=("parallel",),   # >=2 even steps -> both TCs on v7x
            vmem_limit_bytes=32 << 20,           # budgeted for v7x's 64 MiB VMEM
        ),
    )(x, w1, b1, w2, b2, w3, b3)

    return out[:B]


def init_params(key):
    """Deterministic init mimicking nn.Linear's uniform(-1/sqrt(fan_in), 1/sqrt(fan_in))."""
    def linear(key, fan_in, fan_out):
        kw, kb = jax.random.split(key)
        bound = 1.0 / jnp.sqrt(jnp.float32(fan_in))
        # stored as (in, out) = torch weight (out, in) transposed
        w = jax.random.uniform(kw, (fan_in, fan_out), jnp.float32, -bound, bound)
        b = jax.random.uniform(kb, (1, fan_out), jnp.float32, -bound, bound)
        return w, b

    k1, k2, k3 = jax.random.split(key, 3)
    w1, b1 = linear(k1, IN_FEATURES, H1)
    w2, b2 = linear(k2, H1, H2)
    w3, b3 = linear(k3, H2, N_CLASSES)
    return w1, b1, w2, b2, w3, b3


def _reference_forward(x_nchw, params):
    w1, b1, w2, b2, w3, b3 = params
    xr = x_nchw.reshape(x_nchw.shape[0], IN_FEATURES)
    h1 = jnp.maximum(xr @ w1 + b1, 0.0)
    h2 = jnp.maximum(h1 @ w2 + b2, 0.0)
    return jax.nn.softmax(h2 @ w3 + b3, axis=-1)


if __name__ == "__main__":
    key = jax.random.PRNGKey(0)
    kx, kx2, kp = jax.random.split(key, 3)

    params = init_params(kp)
    prepped = prepare_params(params)          # bf16 + zero-padded hidden dim, done once

    # --- small batch (single grid step) ---
    B = 8
    x = jax.random.normal(kx, (B, 1, 28, 28), jnp.float32)   # NCHW like PyTorch MNIST
    out = jax.block_until_ready(mnist_net_forward(x, prepped))

    assert out.shape == (B, N_CLASSES)
    assert bool(jnp.all(out >= 0.0))
    assert bool(jnp.allclose(jnp.sum(out, axis=-1), 1.0, atol=1e-5))   # exact divide now
    ref = _reference_forward(x, params)
    assert float(jnp.max(jnp.abs(out - ref))) < 2e-2                   # bf16 MXU tolerance

    # --- larger, non-multiple batch (exercises >=2 grid steps + batch padding) ---
    B2 = 300
    x2 = jax.random.normal(kx2, (B2, 1, 28, 28), jnp.float32)
    out2 = jax.block_until_ready(mnist_net_forward(x2, prepped))

    assert out2.shape == (B2, N_CLASSES)
    assert bool(jnp.allclose(jnp.sum(out2, axis=-1), 1.0, atol=1e-5))
    ref2 = _reference_forward(x2, params)
    assert float(jnp.max(jnp.abs(out2 - ref2))) < 2e-2

    print("KERNEL_OK")
</pallas_src>

<mosaic_0001>
module attributes {stable_mosaic.version = 11 : i64} {
  func.func @mnist_mlp_kernel(%arg0: i32, %arg1: memref<8x784xbf16, #tpu.memory_space<vmem>>, %arg2: memref<784x512xbf16, #tpu.memory_space<vmem>>, %arg3: memref<1x512xf32, #tpu.memory_space<vmem>>, %arg4: memref<512x256xbf16, #tpu.memory_space<vmem>>, %arg5: memref<1x256xf32, #tpu.memory_space<vmem>>, %arg6: memref<256x10xbf16, #tpu.memory_space<vmem>>, %arg7: memref<1x10xf32, #tpu.memory_space<vmem>>, %arg8: memref<8x10xf32, #tpu.memory_space<vmem>>) attributes {dimension_semantics = [#tpu.dimension_semantics<parallel>], iteration_bounds = array<i64: 1>, scalar_prefetch = 0 : i64, scratch_operands = 0 : i64, tpu.core_type = #tpu.core_type<tc>, window_params = [{transform_indices = @transform_0, window_bounds = array<i64: 8, 784>}, {pipeline_mode = #tpu.pipeline_mode<synchronous>, transform_indices = @transform_1, window_bounds = array<i64: 784, 512>}, {pipeline_mode = #tpu.pipeline_mode<synchronous>, transform_indices = @transform_2, window_bounds = array<i64: 1, 512>}, {pipeline_mode = #tpu.pipeline_mode<synchronous>, transform_indices = @transform_3, window_bounds = array<i64: 512, 256>}, {pipeline_mode = #tpu.pipeline_mode<synchronous>, transform_indices = @transform_4, window_bounds = array<i64: 1, 256>}, {pipeline_mode = #tpu.pipeline_mode<synchronous>, transform_indices = @transform_5, window_bounds = array<i64: 256, 10>}, {pipeline_mode = #tpu.pipeline_mode<synchronous>, transform_indices = @transform_6, window_bounds = array<i64: 1, 10>}, {transform_indices = @transform_7, window_bounds = array<i64: 8, 10>}]} {
    %c0 = arith.constant 0 : index
    %c0_0 = arith.constant 0 : index
    %0 = vector.load %arg1[%c0, %c0_0] : memref<8x784xbf16, #tpu.memory_space<vmem>>, vector<8x784xbf16>
    %c0_1 = arith.constant 0 : index
    %c0_2 = arith.constant 0 : index
    %1 = vector.load %arg2[%c0_1, %c0_2] : memref<784x512xbf16, #tpu.memory_space<vmem>>, vector<784x512xbf16>
    %cst = arith.constant dense<0.000000e+00> : vector<8x512xf32>
    %2 = tpu.matmul %0, %1, %cst {dimension_numbers = #tpu.dot_dimension_numbers<[1], [0], [0], [1], [0, 0, 1, 1], [], []>} : vector<8x784xbf16>, vector<784x512xbf16>, vector<8x512xf32> -> vector<8x512xf32>
    %c0_3 = arith.constant 0 : index
    %c0_4 = arith.constant 0 : index
    %3 = vector.load %arg3[%c0_3, %c0_4] : memref<1x512xf32, #tpu.memory_space<vmem>>, vector<1x512xf32>
    %4 = vector.broadcast %3 : vector<1x512xf32> to vector<8x512xf32>
    %5 = arith.addf %2, %4 : vector<8x512xf32>
    %cst_5 = arith.constant 0.000000e+00 : f32
    %6 = vector.broadcast %cst_5 : f32 to vector<8x512xf32>
    %7 = arith.maximumf %5, %6 : vector<8x512xf32>
    %8 = arith.truncf %7 : vector<8x512xf32> to vector<8x512xbf16>
    %c0_6 = arith.constant 0 : index
    %c0_7 = arith.constant 0 : index
    %9 = vector.load %arg4[%c0_6, %c0_7] : memref<512x256xbf16, #tpu.memory_space<vmem>>, vector<512x256xbf16>
    %cst_8 = arith.constant dense<0.000000e+00> : vector<8x256xf32>
    %10 = tpu.matmul %8, %9, %cst_8 {dimension_numbers = #tpu.dot_dimension_numbers<[1], [0], [0], [1], [0, 0, 1, 1], [], []>} : vector<8x512xbf16>, vector<512x256xbf16>, vector<8x256xf32> -> vector<8x256xf32>
    %c0_9 = arith.constant 0 : index
    %c0_10 = arith.constant 0 : index
    %11 = vector.load %arg5[%c0_9, %c0_10] : memref<1x256xf32, #tpu.memory_space<vmem>>, vector<1x256xf32>
    %12 = vector.broadcast %11 : vector<1x256xf32> to vector<8x256xf32>
    %13 = arith.addf %10, %12 : vector<8x256xf32>
    %cst_11 = arith.constant 0.000000e+00 : f32
    %14 = vector.broadcast %cst_11 : f32 to vector<8x256xf32>
    %15 = arith.maximumf %13, %14 : vector<8x256xf32>
    %16 = arith.truncf %15 : vector<8x256xf32> to vector<8x256xbf16>
    %c0_12 = arith.constant 0 : index
    %c0_13 = arith.constant 0 : index
    %17 = vector.load %arg6[%c0_12, %c0_13] : memref<256x10xbf16, #tpu.memory_space<vmem>>, vector<256x10xbf16>
    %cst_14 = arith.constant dense<0.000000e+00> : vector<8x10xf32>
    %18 = tpu.matmul %16, %17, %cst_14 {dimension_numbers = #tpu.dot_dimension_numbers<[1], [0], [0], [1], [0, 0, 1, 1], [], []>} : vector<8x256xbf16>, vector<256x10xbf16>, vector<8x10xf32> -> vector<8x10xf32>
    %c0_15 = arith.constant 0 : index
    %c0_16 = arith.constant 0 : index
    %19 = vector.load %arg7[%c0_15, %c0_16] : memref<1x10xf32, #tpu.memory_space<vmem>>, vector<1x10xf32>
    %20 = vector.broadcast %19 : vector<1x10xf32> to vector<8x10xf32>
    %21 = arith.addf %18, %20 : vector<8x10xf32>
    %cst_17 = arith.constant dense<0xFF800000> : vector<8xf32>
    %22 = vector.multi_reduction <maximumf>, %21, %cst_17 [1] : vector<8x10xf32> to vector<8xf32>
    %23 = vector.shape_cast %22 : vector<8xf32> to vector<8x1xf32>
    %24 = vector.broadcast %23 : vector<8x1xf32> to vector<8x10xf32>
    %25 = arith.subf %21, %24 : vector<8x10xf32>
    %26 = math.exp %25 : vector<8x10xf32>
    %cst_18 = arith.constant dense<0.000000e+00> : vector<8xf32>
    %27 = vector.multi_reduction <add>, %26, %cst_18 [1] : vector<8x10xf32> to vector<8xf32>
    %28 = vector.shape_cast %27 : vector<8xf32> to vector<8x1xf32>
    %29 = vector.broadcast %28 : vector<8x1xf32> to vector<8x10xf32>
    %30 = arith.divf %26, %29 : vector<8x10xf32>
    %c0_19 = arith.constant 0 : index
    %c0_20 = arith.constant 0 : index
    %31 = vector.load %arg8[%c0_19, %c0_20] : memref<8x10xf32, #tpu.memory_space<vmem>>, vector<8x10xf32>
    tpu.vector_store %arg8[%c0_19, %c0_20], %30 {strides = array<i32>} : memref<8x10xf32, #tpu.memory_space<vmem>>, vector<8x10xf32>,
    return
  }
  func.func @transform_0(%arg0: i32) -> (i32, i32) {
    %c0_i32 = arith.constant 0 : i32
    %c0_i32_0 = arith.constant 0 : i32
    return %arg0, %c0_i32 : i32, i32
  }
  func.func @transform_1(%arg0: i32) -> (i32, i32) {
    %c0_i32 = arith.constant 0 : i32
    %c0_i32_0 = arith.constant 0 : i32
    %c0_i32_1 = arith.constant 0 : i32
    return %c0_i32, %c0_i32_0 : i32, i32
  }
  func.func @transform_2(%arg0: i32) -> (i32, i32) {
    %c0_i32 = arith.constant 0 : i32
    %c0_i32_0 = arith.constant 0 : i32
    %c0_i32_1 = arith.constant 0 : i32
    return %c0_i32, %c0_i32_0 : i32, i32
  }
  func.func @transform_3(%arg0: i32) -> (i32, i32) {
    %c0_i32 = arith.constant 0 : i32
    %c0_i32_0 = arith.constant 0 : i32
    %c0_i32_1 = arith.constant 0 : i32
    return %c0_i32, %c0_i32_0 : i32, i32
  }
  func.func @transform_4(%arg0: i32) -> (i32, i32) {
    %c0_i32 = arith.constant 0 : i32
    %c0_i32_0 = arith.constant 0 : i32
    %c0_i32_1 = arith.constant 0 : i32
    return %c0_i32, %c0_i32_0 : i32, i32
  }
  func.func @transform_5(%arg0: i32) -> (i32, i32) {
    %c0_i32 = arith.constant 0 : i32
    %c0_i32_0 = arith.constant 0 : i32
    %c0_i32_1 = arith.constant 0 : i32
    return %c0_i32, %c0_i32_0 : i32, i32
  }
  func.func @transform_6(%arg0: i32) -> (i32, i32) {
    %c0_i32 = arith.constant 0 : i32
    %c0_i32_0 = arith.constant 0 : i32
    %c0_i32_1 = arith.constant 0 : i32
    return %c0_i32, %c0_i32_0 : i32, i32
  }
  func.func @transform_7(%arg0: i32) -> (i32, i32) {
    %c0_i32 = arith.constant 0 : i32
    %c0_i32_0 = arith.constant 0 : i32
    return %arg0, %c0_i32 : i32, i32
  }
}

</mosaic_0001>

<bundles_post_ra>
// kernel: mnist_net_forward.1
= control target key start
LH: loop header
LB: loop body
LE: loop exit
PB: predicated region body
PF: predicated region fallthrough
CT: control target
= control target key end

     0   :  { %12 = vsyncpa [#allocation3], 0  ;;  %s3490_s0 = inlined_call_operand.vmem [shape: bf16[8,784], index: 0, kind: input, shape index: {}]   ;;  %s3491_s1 = inlined_call_operand.hbm [shape: bf16[784,512], index: 1, kind: input, shape index: {}]   ;;  %s3492_s2 = inlined_call_operand.vmem [shape: f32[1,512], index: 2, kind: input, shape index: {}]   ;;  %s3493_s3 = inlined_call_operand.vmem [shape: bf16[512,256], index: 3, kind: input, shape index: {}]   ;;  %s3494_s4 = inlined_call_operand.vmem [shape: f32[1,256], index: 4, kind: input, shape index: {}]   ;;  %s3495_s5 = inlined_call_operand.vmem [shape: bf16[256,10], index: 5, kind: input, shape index: {}]   ;;  %s3496_s6 = inlined_call_operand.vmem [shape: f32[1,10], index: 6, kind: input, shape index: {}]   ;;  %s3497_s7 = inlined_call_operand.hbm [shape: f32[8,10], index: 7, kind: output, shape index: {}]  }
   0x1   :  { %13 = vsyncpa [#allocation4], 0  ;;  %s3101_s24 = smov [#allocation2]   ;;  %s3053_s28 = scalar_lea.hbm %s3491_s1, 25088 }
   0x2   :  { %s21_s25 = sshll.u32 %s3101_s24, 4  ;;  %p3054_p0 = scmp.ne.s32.totalorder %s3491_s1, %s3053_s28  ;;  %s22_s25 = int_to_ptr.vmem [resolvable:$true] %s21_s25 }
   0x3   :  { %p3057_p1 = scmp.lt.u32.totalorder %s3053_s28, %s3491_s1 }
   0x5   :  { %p3059_p2 = pnand %p3057_p1, %p3054_p0 }
   0x7   :  { %3062 = shalt.err (!%p3059_p2)
}
   0x8   :  { %s3063_s10 = scalar_lea.vmem %s22_s25, 25088  ;;  %p3068_p4 = scmp.lt.s32.totalorder %s22_s25, %s22_s25 }
   0x9   :  { %p3064_p3 = scmp.ne.s32.totalorder %s22_s25, %s3063_s10  ;;  %p3069_p5 = scmp.lt.s32.totalorder %s3063_s10, %s3063_s10 }
   0xb   :  { %p3070_p6 = por %p3069_p5, %p3068_p4 }
   0xd   :  { %p3071_p7 = pnand %p3070_p6, %p3064_p3 }
   0xf   :  { %3074 = shalt.err (!%p3071_p7)
}
  0x10   :  { %s3102_s11 = smov 256   ;;  %s3103_s12 = smov 16  }
  0x11   :  { %27 = dma.hbm_to_vmem [thread:$0]  %s3491_s1, 25088, %s22_s25, [#allocation3], %s3102_s11, %s3102_s11, %s3103_s12  }
  0x12   :  { %3097 = dma.done.wait [#allocation3], 25088  }
  0x13   :  { %3098 = vsyncadd [#allocation3], 4294942208  ;;  %v2636_v0 = vld [vmem:[#allocation2 + $0x4] ss:$16 sps:$4 sm:$0xff]   ;;  %v2640_v2 = vld [vmem:[#allocation2] ss:$16 sps:$4 sm:$0xff]  }
  0x14   :  { %v2638_v1 = vld [vmem:[#allocation2 + $0x204] ss:$16 sps:$4 sm:$0xff]   ;;  %1272 = vmatprep.subr.bf16.mxu1 %v2636_v0  ;;  %v2641_v3 = vld [vmem:[#allocation2 + $0x200] ss:$16 sps:$4 sm:$0xff]   ;;  %v43_v48 = vld [vmem:[%s3490_s0 + $0x8] sm:$0xff]  ;;  %vm1268_vm0 = vcmask 130048  }
  0x15   :  { %1313 = vmatprep.subr.bf16.mxu0 %v2638_v1  ;;  %v2642_v4 = vld [vmem:[#allocation2 + $0x24] ss:$16 sps:$4 sm:$0xff]   ;;  %1273 = vmatpush1.bf16.msra.mxu1 %v2640_v2  ;;  %v2646_v6 = vld [vmem:[#allocation2 + $0x20] ss:$16 sps:$4 sm:$0xff]   ;;  %v3166_v51 = vcombine.high %v43_v48, %v43_v48  ;;  %vm2265_vm1 = vcmask 80896   ;;  %s3105_s30 = smov [#allocation5]  }
  0x16   :  { %1314 = vmatpush1.bf16.msra.mxu0 %v2641_v3  ;;  %v2644_v5 = vld [vmem:[#allocation2 + $0x224] ss:$16 sps:$4 sm:$0xff]   ;;  %1274 = vmatprep.subr.bf16.mxu1 %v2642_v4  ;;  %v2647_v7 = vld [vmem:[#allocation2 + $0x220] ss:$16 sps:$4 sm:$0xff]  }
  0x17   :  { %1315 = vmatprep.subr.bf16.mxu0 %v2644_v5  ;;  %v2648_v8 = vld [vmem:[#allocation2 + $0x44] ss:$16 sps:$4 sm:$0xff]   ;;  %v2652_v10 = vld [vmem:[#allocation2 + $0x40] ss:$16 sps:$4 sm:$0xff]   ;;  %1345 = vmatprep.mubr.bf16.mxu0 %v3166_v51  ;;  %v2741_v5 = vld [vmem:[#allocation2 + $0xc] ss:$16 sps:$4 sm:$0xff]  }
  0x18   :  { %v2650_v9 = vld [vmem:[#allocation2 + $0x244] ss:$16 sps:$4 sm:$0xff]   ;;  %v2653_v11 = vld [vmem:[#allocation2 + $0x240] ss:$16 sps:$4 sm:$0xff]  }
  0x19   :  { %1275 = vmatpush1.bf16.msra.mxu1 %v2646_v6  ;;  %v2654_v12 = vld [vmem:[#allocation2 + $0x64] ss:$16 sps:$4 sm:$0xff]   ;;  %v2658_v14 = vld [vmem:[#allocation2 + $0x60] ss:$16 sps:$4 sm:$0xff]  }
  0x1a   :  { %1316 = vmatpush1.bf16.msra.mxu0 %v2647_v7  ;;  %1276 = vmatprep.subr.bf16.mxu1 %v2648_v8  ;;  %v2656_v13 = vld [vmem:[#allocation2 + $0x264] ss:$16 sps:$4 sm:$0xff]   ;;  %v2659_v15 = vld [vmem:[#allocation2 + $0x260] ss:$16 sps:$4 sm:$0xff]   ;;  %v3172_v7 = vcombine.low %v43_v48, %v43_v48 }
  0x1b   :  { %1317 = vmatprep.subr.bf16.mxu0 %v2650_v9  ;;  %v2660_v16 = vld [vmem:[#allocation2 + $0x84] ss:$16 sps:$4 sm:$0xff]   ;;  %v2664_v18 = vld [vmem:[#allocation2 + $0x80] ss:$16 sps:$4 sm:$0xff]   ;;  %v2739_v9 = vld [vmem:[#allocation2 + $0x8] ss:$16 sps:$4 sm:$0xff]  }
  0x1c   :  { %v2662_v17 = vld [vmem:[#allocation2 + $0x284] ss:$16 sps:$4 sm:$0xff]   ;;  %v2665_v19 = vld [vmem:[#allocation2 + $0x280] ss:$16 sps:$4 sm:$0xff]  }
  0x1d   :  { %1277 = vmatpush1.bf16.msra.mxu1 %v2652_v10  ;;  %v2666_v20 = vld [vmem:[#allocation2 + $0xa4] ss:$16 sps:$4 sm:$0xff]   ;;  %v2670_v22 = vld [vmem:[#allocation2 + $0xa0] ss:$16 sps:$4 sm:$0xff]  }
  0x1e   :  { %1318 = vmatpush1.bf16.msra.mxu0 %v2653_v11  ;;  %1278 = vmatprep.subr.bf16.mxu1 %v2654_v12  ;;  %v2668_v21 = vld [vmem:[#allocation2 + $0x2a4] ss:$16 sps:$4 sm:$0xff]   ;;  %v2671_v23 = vld [vmem:[#allocation2 + $0x2a0] ss:$16 sps:$4 sm:$0xff]   ;;  %v2747_v11 = vld [vmem:[#allocation2 + $0x2c] ss:$16 sps:$4 sm:$0xff]  }
  0x1f   :  { %1319 = vmatprep.subr.bf16.mxu0 %v2656_v13  ;;  %v2672_v24 = vld [vmem:[#allocation2 + $0xc4] ss:$16 sps:$4 sm:$0xff]   ;;  %v2676_v26 = vld [vmem:[#allocation2 + $0xc0] ss:$16 sps:$4 sm:$0xff]   ;;  %v2745_v13 = vld [vmem:[#allocation2 + $0x28] ss:$16 sps:$4 sm:$0xff]  }
  0x20   :  { %v2674_v25 = vld [vmem:[#allocation2 + $0x2c4] ss:$16 sps:$4 sm:$0xff]   ;;  %v2677_v27 = vld [vmem:[#allocation2 + $0x2c0] ss:$16 sps:$4 sm:$0xff]  }
  0x21   :  { %1279 = vmatpush1.bf16.msra.mxu1 %v2658_v14  ;;  %v2678_v28 = vld [vmem:[#allocation2 + $0xe4] ss:$16 sps:$4 sm:$0xff]   ;;  %v2682_v30 = vld [vmem:[#allocation2 + $0xe0] ss:$16 sps:$4 sm:$0xff]  }
  0x22   :  { %1320 = vmatpush1.bf16.msra.mxu0 %v2659_v15  ;;  %1280 = vmatprep.subr.bf16.mxu1 %v2660_v16  ;;  %v2680_v29 = vld [vmem:[#allocation2 + $0x2e4] ss:$16 sps:$4 sm:$0xff]   ;;  %v2683_v31 = vld [vmem:[#allocation2 + $0x2e0] ss:$16 sps:$4 sm:$0xff]   ;;  %v2753_v15 = vld [vmem:[#allocation2 + $0x4c] ss:$16 sps:$4 sm:$0xff]  }
  0x23   :  { %1321 = vmatprep.subr.bf16.mxu0 %v2662_v17  ;;  %v2684_v32 = vld [vmem:[#allocation2 + $0x104] ss:$16 sps:$4 sm:$0xff]   ;;  %v2688_v34 = vld [vmem:[#allocation2 + $0x100] ss:$16 sps:$4 sm:$0xff]   ;;  %v2751_v17 = vld [vmem:[#allocation2 + $0x48] ss:$16 sps:$4 sm:$0xff]  }
  0x24   :  { %v2686_v33 = vld [vmem:[#allocation2 + $0x304] ss:$16 sps:$4 sm:$0xff]   ;;  %v2689_v35 = vld [vmem:[#allocation2 + $0x300] ss:$16 sps:$4 sm:$0xff]  }
  0x25   :  { %1281 = vmatpush1.bf16.msra.mxu1 %v2664_v18  ;;  %v2690_v36 = vld [vmem:[#allocation2 + $0x124] ss:$16 sps:$4 sm:$0xff]   ;;  %v2694_v38 = vld [vmem:[#allocation2 + $0x120] ss:$16 sps:$4 sm:$0xff]  }
  0x26   :  { %1322 = vmatpush1.bf16.msra.mxu0 %v2665_v19  ;;  %1282 = vmatprep.subr.bf16.mxu1 %v2666_v20  ;;  %v2692_v37 = vld [vmem:[#allocation2 + $0x324] ss:$16 sps:$4 sm:$0xff]   ;;  %v2695_v39 = vld [vmem:[#allocation2 + $0x320] ss:$16 sps:$4 sm:$0xff]   ;;  %v2759_v19 = vld [vmem:[#allocation2 + $0x6c] ss:$16 sps:$4 sm:$0xff]  }
  0x27   :  { %1323 = vmatprep.subr.bf16.mxu0 %v2668_v21  ;;  %v2696_v40 = vld [vmem:[#allocation2 + $0x144] ss:$16 sps:$4 sm:$0xff]   ;;  %v2700_v42 = vld [vmem:[#allocation2 + $0x140] ss:$16 sps:$4 sm:$0xff]   ;;  %v2757_v21 = vld [vmem:[#allocation2 + $0x68] ss:$16 sps:$4 sm:$0xff]  }
  0x28   :  { %v2698_v41 = vld [vmem:[#allocation2 + $0x344] ss:$16 sps:$4 sm:$0xff]   ;;  %v2701_v43 = vld [vmem:[#allocation2 + $0x340] ss:$16 sps:$4 sm:$0xff]  }
  0x29   :  { %1283 = vmatpush1.bf16.msra.mxu1 %v2670_v22  ;;  %v2702_v44 = vld [vmem:[#allocation2 + $0x164] ss:$16 sps:$4 sm:$0xff]   ;;  %v2706_v49 = vld [vmem:[#allocation2 + $0x160] ss:$16 sps:$4 sm:$0xff]  }
  0x2a   :  { %1324 = vmatpush1.bf16.msra.mxu0 %v2671_v23  ;;  %1284 = vmatprep.subr.bf16.mxu1 %v2672_v24  ;;  %v2704_v45 = vld [vmem:[#allocation2 + $0x364] ss:$16 sps:$4 sm:$0xff]   ;;  %v2707_v50 = vld [vmem:[#allocation2 + $0x360] ss:$16 sps:$4 sm:$0xff]   ;;  %v2765_v23 = vld [vmem:[#allocation2 + $0x8c] ss:$16 sps:$4 sm:$0xff]  }
  0x2b   :  { %1325 = vmatprep.subr.bf16.mxu0 %v2674_v25  ;;  %v42_v46 = vld [vmem:[%s3490_s0] sm:$0xff]  ;;  %v2763_v25 = vld [vmem:[#allocation2 + $0x88] ss:$16 sps:$4 sm:$0xff]  }
  0x2c   :  { %v3161_v47 = vcombine.high %v42_v46, %v42_v46  ;;  %v2708_v52 = vld [vmem:[#allocation2 + $0x184] ss:$16 sps:$4 sm:$0xff]   ;;  %v2712_v54 = vld [vmem:[#allocation2 + $0x180] ss:$16 sps:$4 sm:$0xff]   ;;  %v3170_v6 = vcombine.low %v42_v46, %v42_v46 }
  0x2d   :  { %1285 = vmatpush1.bf16.msra.mxu1 %v2676_v26  ;;  %v2710_v53 = vld [vmem:[#allocation2 + $0x384] ss:$16 sps:$4 sm:$0xff]   ;;  %v2713_v55 = vld [vmem:[#allocation2 + $0x380] ss:$16 sps:$4 sm:$0xff]  }
  0x2e   :  { %1326 = vmatpush1.bf16.msra.mxu0 %v2677_v27  ;;  %1286 = vmatprep.subr.bf16.mxu1 %v2678_v28  ;;  %v2714_v56 = vld [vmem:[#allocation2 + $0x1a4] ss:$16 sps:$4 sm:$0xff]   ;;  %v2718_v58 = vld [vmem:[#allocation2 + $0x1a0] ss:$16 sps:$4 sm:$0xff]   ;;  %v2771_v27 = vld [vmem:[#allocation2 + $0xac] ss:$16 sps:$4 sm:$0xff]  }
  0x2f   :  { %1327 = vmatprep.subr.bf16.mxu0 %v2680_v29  ;;  %1304 = vmatprep.mubr.bf16.mxu1 %v3161_v47  ;;  %v2716_v57 = vld [vmem:[#allocation2 + $0x3a4] ss:$16 sps:$4 sm:$0xff]   ;;  %v2719_v59 = vld [vmem:[#allocation2 + $0x3a0] ss:$16 sps:$4 sm:$0xff]   ;;  %v2769_v29 = vld [vmem:[#allocation2 + $0xa8] ss:$16 sps:$4 sm:$0xff]  }
  0x30   :  { %v2720_v60 = vld [vmem:[#allocation2 + $0x1c4] ss:$16 sps:$4 sm:$0xff]   ;;  %v2724_v62 = vld [vmem:[#allocation2 + $0x1c0] ss:$16 sps:$4 sm:$0xff]  }
  0x31   :  { %1287 = vmatpush1.bf16.msra.mxu1 %v2682_v30  ;;  %v2722_v61 = vld [vmem:[#allocation2 + $0x3c4] ss:$16 sps:$4 sm:$0xff]   ;;  %v2725_v63 = vld [vmem:[#allocation2 + $0x3c0] ss:$16 sps:$4 sm:$0xff]  }
  0x32   :  { %1328 = vmatpush1.bf16.msra.mxu0 %v2683_v31  ;;  %1288 = vmatprep.subr.bf16.mxu1 %v2684_v32  ;;  %v2726_v0 = vld [vmem:[#allocation2 + $0x1e4] ss:$16 sps:$4 sm:$0xff]   ;;  %v2730_v2 = vld [vmem:[#allocation2 + $0x1e0] ss:$16 sps:$4 sm:$0xff]   ;;  %v2777_v31 = vld [vmem:[#allocation2 + $0xcc] ss:$16 sps:$4 sm:$0xff]  }
  0x33   :  { %1329 = vmatprep.subr.bf16.mxu0 %v2686_v33  ;;  %v2728_v1 = vld [vmem:[#allocation2 + $0x3e4] ss:$16 sps:$4 sm:$0xff]   ;;  %v2731_v3 = vld [vmem:[#allocation2 + $0x3e0] ss:$16 sps:$4 sm:$0xff]  }
  0x34   :  { %v2738_v4 = vld [vmem:[#allocation2 + $0x404] ss:$16 sps:$4 sm:$0xff]   ;;  %v2736_v8 = vld [vmem:[#allocation2 + $0x400] ss:$16 sps:$4 sm:$0xff]  }
  0x35   :  { %1289 = vmatpush1.bf16.msra.mxu1 %v2688_v34  ;;  %v2744_v10 = vld [vmem:[#allocation2 + $0x424] ss:$16 sps:$4 sm:$0xff]   ;;  %v2742_v12 = vld [vmem:[#allocation2 + $0x420] ss:$16 sps:$4 sm:$0xff]  }
  0x36   :  { %1330 = vmatpush1.bf16.msra.mxu0 %v2689_v35  ;;  %1290 = vmatprep.subr.bf16.mxu1 %v2690_v36  ;;  %v2750_v14 = vld [vmem:[#allocation2 + $0x444] ss:$16 sps:$4 sm:$0xff]   ;;  %v2748_v16 = vld [vmem:[#allocation2 + $0x440] ss:$16 sps:$4 sm:$0xff]   ;;  %v2775_v35 = vld [vmem:[#allocation2 + $0xc8] ss:$16 sps:$4 sm:$0xff]  }
  0x37   :  { %1331 = vmatprep.subr.bf16.mxu0 %v2692_v37  ;;  %v2756_v18 = vld [vmem:[#allocation2 + $0x464] ss:$16 sps:$4 sm:$0xff]   ;;  %v2754_v20 = vld [vmem:[#allocation2 + $0x460] ss:$16 sps:$4 sm:$0xff]   ;;  %v2783_v37 = vld [vmem:[#allocation2 + $0xec] ss:$16 sps:$4 sm:$0xff]  }
  0x38   :  { %v2762_v22 = vld [vmem:[#allocation2 + $0x484] ss:$16 sps:$4 sm:$0xff]   ;;  %v2760_v24 = vld [vmem:[#allocation2 + $0x480] ss:$16 sps:$4 sm:$0xff]  }
  0x39   :  { %1291 = vmatpush1.bf16.msra.mxu1 %v2694_v38  ;;  %v2768_v26 = vld [vmem:[#allocation2 + $0x4a4] ss:$16 sps:$4 sm:$0xff]   ;;  %v2766_v28 = vld [vmem:[#allocation2 + $0x4a0] ss:$16 sps:$4 sm:$0xff]  }
  0x3a   :  { %1332 = vmatpush1.bf16.msra.mxu0 %v2695_v39  ;;  %1292 = vmatprep.subr.bf16.mxu1 %v2696_v40  ;;  %v2774_v30 = vld [vmem:[#allocation2 + $0x4c4] ss:$16 sps:$4 sm:$0xff]   ;;  %v2772_v33 = vld [vmem:[#allocation2 + $0x4c0] ss:$16 sps:$4 sm:$0xff]   ;;  %v2781_v39 = vld [vmem:[#allocation2 + $0xe8] ss:$16 sps:$4 sm:$0xff]  }
  0x3b   :  { %1333 = vmatprep.subr.bf16.mxu0 %v2698_v41  ;;  %v3180_v32 = vld [vmem:[%s3490_s0 + $0x10] sm:$0xff]  ;;  %v2789_v41 = vld [vmem:[#allocation2 + $0x10c] ss:$16 sps:$4 sm:$0xff]  }
  0x3c   :  { %v3184_v34 = vcombine.high %v3180_v32, %v3180_v32  ;;  %v2780_v36 = vld [vmem:[#allocation2 + $0x4e4] ss:$16 sps:$4 sm:$0xff]   ;;  %v2778_v38 = vld [vmem:[#allocation2 + $0x4e0] ss:$16 sps:$4 sm:$0xff]  }
  0x3d   :  { %1293 = vmatpush1.bf16.msra.mxu1 %v2700_v42  ;;  %v2786_v40 = vld [vmem:[#allocation2 + $0x504] ss:$16 sps:$4 sm:$0xff]   ;;  %v2784_v42 = vld [vmem:[#allocation2 + $0x500] ss:$16 sps:$4 sm:$0xff]  }
  0x3e   :  { %1334 = vmatpush1.bf16.msra.mxu0 %v2701_v43  ;;  %1294 = vmatprep.subr.bf16.mxu1 %v2702_v44  ;;  %v2787_v43 = vld [vmem:[#allocation2 + $0x108] ss:$16 sps:$4 sm:$0xff]   ;;  %v2792_v44 = vld [vmem:[#allocation2 + $0x524] ss:$16 sps:$4 sm:$0xff]   ;;  %v2790_v46 = vld [vmem:[#allocation2 + $0x520] ss:$16 sps:$4 sm:$0xff]  }
  0x3f   :  { %1335 = vmatprep.subr.bf16.mxu0 %v2704_v45  ;;  %v2795_v45 = vld [vmem:[#allocation2 + $0x12c] ss:$16 sps:$4 sm:$0xff]   ;;  %v2798_v48 = vld [vmem:[#allocation2 + $0x544] ss:$16 sps:$4 sm:$0xff]  }
  0x41   :  { %1295 = vmatpush1.bf16.msra.mxu1 %v2706_v49  ;;  %v2801_v49 = vld [vmem:[#allocation2 + $0x14c] ss:$16 sps:$4 sm:$0xff]  }
  0x42   :  { %1336 = vmatpush1.bf16.msra.mxu0 %v2707_v50  ;;  %1296 = vmatprep.subr.bf16.mxu1 %v2708_v52  ;;  %v2796_v50 = vld [vmem:[#allocation2 + $0x540] ss:$16 sps:$4 sm:$0xff]   ;;  %v2799_v52 = vld [vmem:[#allocation2 + $0x148] ss:$16 sps:$4 sm:$0xff]  }
  0x43   :  { %1337 = vmatprep.subr.bf16.mxu0 %v2710_v53  ;;  %v2804_v53 = vld [vmem:[#allocation2 + $0x564] ss:$16 sps:$4 sm:$0xff]  }
  0x45   :  { %1297 = vmatpush1.bf16.msra.mxu1 %v2712_v54  ;;  %v2807_v54 = vld [vmem:[#allocation2 + $0x16c] ss:$16 sps:$4 sm:$0xff]  }
  0x46   :  { %1338 = vmatpush1.bf16.msra.mxu0 %v2713_v55  ;;  %1298 = vmatprep.subr.bf16.mxu1 %v2714_v56  ;;  %v2802_v55 = vld [vmem:[#allocation2 + $0x560] ss:$16 sps:$4 sm:$0xff]   ;;  %v2805_v56 = vld [vmem:[#allocation2 + $0x168] ss:$16 sps:$4 sm:$0xff]  }
  0x47   :  { %1339 = vmatprep.subr.bf16.mxu0 %v2716_v57  ;;  %v2810_v57 = vld [vmem:[#allocation2 + $0x584] ss:$16 sps:$4 sm:$0xff]  }
  0x49   :  { %1299 = vmatpush1.bf16.msra.mxu1 %v2718_v58  ;;  %v2813_v58 = vld [vmem:[#allocation2 + $0x18c] ss:$16 sps:$4 sm:$0xff]  }
  0x4a   :  { %1340 = vmatpush1.bf16.msra.mxu0 %v2719_v59  ;;  %1300 = vmatprep.subr.bf16.mxu1 %v2720_v60  ;;  %v2808_v59 = vld [vmem:[#allocation2 + $0x580] ss:$16 sps:$4 sm:$0xff]   ;;  %v2811_v60 = vld [vmem:[#allocation2 + $0x188] ss:$16 sps:$4 sm:$0xff]  }
  0x4b   :  { %1341 = vmatprep.subr.bf16.mxu0 %v2722_v61  ;;  %v2816_v61 = vld [vmem:[#allocation2 + $0x5a4] ss:$16 sps:$4 sm:$0xff]  }
  0x4d   :  { %1301 = vmatpush1.bf16.msra.mxu1 %v2724_v62  ;;  %v2819_v62 = vld [vmem:[#allocation2 + $0x1ac] ss:$16 sps:$4 sm:$0xff]  }
  0x4e   :  { %1342 = vmatpush1.bf16.msra.mxu0 %v2725_v63  ;;  %1302 = vmatprep.subr.bf16.mxu1 %v2726_v0  ;;  %v2814_v63 = vld [vmem:[#allocation2 + $0x5a0] ss:$16 sps:$4 sm:$0xff]   ;;  %v2817_v0 = vld [vmem:[#allocation2 + $0x1a8] ss:$16 sps:$4 sm:$0xff]  }
  0x4f   :  { %1343 = vmatprep.subr.bf16.mxu0 %v2728_v1  ;;  %v2822_v1 = vld [vmem:[#allocation2 + $0x5c4] ss:$16 sps:$4 sm:$0xff]  }
  0x51   :  { %1303 = vmatpush1.bf16.msra.mxu1 %v2730_v2  ;;  %v2825_v2 = vld [vmem:[#allocation2 + $0x1cc] ss:$16 sps:$4 sm:$0xff]  }
  0x52   :  { %1344 = vmatpush1.bf16.msra.mxu0 %v2731_v3  ;;  %1436 = vmatprep.subr.bf16.mxu1 %v2741_v5  ;;  %v2820_v3 = vld [vmem:[#allocation2 + $0x5c0] ss:$16 sps:$4 sm:$0xff]   ;;  %v2828_v5 = vld [vmem:[#allocation2 + $0x5e4] ss:$16 sps:$4 sm:$0xff]  }
  0x53   :  { %1354 = vmatprep.subr.bf16.mxu0 %v2738_v4  ;;  %v2823_v4 = vld [vmem:[#allocation2 + $0x1c8] ss:$16 sps:$4 sm:$0xff]  }
  0x54   :  { %1305 = vmatmul.mubr.bf16.vlgmr.msra.gmra.mrb[0].mxu1 %v3170_v6 }
  0x55   :  { %1346 = vmatmul.mubr.bf16.vlgmr.msra.gmra.mrb[0].mxu0 %v3172_v7  ;;  %1437 = vmatpush1.bf16.msra.mxu1 %v2739_v9  ;;  %v2826_v9 = vld [vmem:[#allocation2 + $0x5e0] ss:$16 sps:$4 sm:$0xff]  }
  0x56   :  { %1355 = vmatpush1.bf16.msra.mxu0 %v2736_v8  ;;  %1438 = vmatprep.subr.bf16.mxu1 %v2747_v11  ;;  %v2831_v8 = vld [vmem:[#allocation2 + $0x1ec] ss:$16 sps:$4 sm:$0xff]  }
  0x57   :  { %1356 = vmatprep.subr.bf16.mxu0 %v2744_v10  ;;  %1468 = vmatprep.mubr.bf16.mxu1 %v3161_v47  ;;  %v2793_v47 = vld [vmem:[#allocation2 + $0x128] ss:$16 sps:$4 sm:$0xff]   ;;  %v2836_v11 = vld [vmem:[#allocation2 + $0x20c] ss:$16 sps:$4 sm:$0xff]  }
  0x58   :  { %1386 = vmatprep.mubr.bf16.mxu0 %v3184_v34  ;;  %v2829_v10 = vld [vmem:[#allocation2 + $0x1e8] ss:$16 sps:$4 sm:$0xff]  }
  0x59   :  { %1439 = vmatpush1.bf16.msra.mxu1 %v2745_v13  ;;  %v3189_v13 = vcombine.low %v3180_v32, %v3180_v32  ;;  %v2939_v32 = vld [vmem:[%s3493_s3 + $0x4] ss:$8 sps:$4 sm:$0xff]  }
  0x5a   :  { %1357 = vmatpush1.bf16.msra.mxu0 %v2742_v12  ;;  %1440 = vmatprep.subr.bf16.mxu1 %v2753_v15  ;;  %v2842_v12 = vld [vmem:[#allocation2 + $0x604] ss:$16 sps:$4 sm:$0xff]   ;;  %v2840_v15 = vld [vmem:[#allocation2 + $0x600] ss:$16 sps:$4 sm:$0xff]  }
  0x5b   :  { %1358 = vmatprep.subr.bf16.mxu0 %v2750_v14  ;;  %v2834_v14 = vld [vmem:[#allocation2 + $0x208] ss:$16 sps:$4 sm:$0xff]  }
  0x5d   :  { %1441 = vmatpush1.bf16.msra.mxu1 %v2751_v17  ;;  %v2933_v17 = vld [vmem:[#allocation2 + $0x60c] ss:$16 sps:$4 sm:$0xff]  }
  0x5e   :  { %1359 = vmatpush1.bf16.msra.mxu0 %v2748_v16  ;;  %1442 = vmatprep.subr.bf16.mxu1 %v2759_v19  ;;  %v2839_v16 = vld [vmem:[#allocation2 + $0x22c] ss:$16 sps:$4 sm:$0xff]  }
  0x5f   :  { %1360 = vmatprep.subr.bf16.mxu0 %v2756_v18  ;;  %v2837_v18 = vld [vmem:[#allocation2 + $0x228] ss:$16 sps:$4 sm:$0xff]   ;;  %v2845_v19 = vld [vmem:[#allocation2 + $0x24c] ss:$16 sps:$4 sm:$0xff]  }
  0x61   :  { %1443 = vmatpush1.bf16.msra.mxu1 %v2757_v21  ;;  %v2843_v21 = vld [vmem:[#allocation2 + $0x248] ss:$16 sps:$4 sm:$0xff]  }
  0x62   :  { %1361 = vmatpush1.bf16.msra.mxu0 %v2754_v20  ;;  %1444 = vmatprep.subr.bf16.mxu1 %v2765_v23  ;;  %v3104_v20 = vmov 0   ;;  %v2846_v23 = vld [vmem:[%s3490_s0 + $0x18] ss:$0 sps:$4 sm:$0xff]  }
  0x63   :  { %1362 = vmatprep.subr.bf16.mxu0 %v2762_v22  ;;  %v2849_v22 = vld [vmem:[#allocation2 + $0x26c] ss:$16 sps:$4 sm:$0xff]  }
  0x65   :  { %1445 = vmatpush1.bf16.msra.mxu1 %v2763_v25  ;;  %v2852_v25 = vld [vmem:[#allocation2 + $0x28c] ss:$16 sps:$4 sm:$0xff]  }
  0x66   :  { %1363 = vmatpush1.bf16.msra.mxu0 %v2760_v24  ;;  %1446 = vmatprep.subr.bf16.mxu1 %v2771_v27  ;;  %v2847_v24 = vld [vmem:[#allocation2 + $0x268] ss:$16 sps:$4 sm:$0xff]   ;;  %v2855_v27 = vld [vmem:[#allocation2 + $0x2ac] ss:$16 sps:$4 sm:$0xff]  }
  0x67   :  { %1364 = vmatprep.subr.bf16.mxu0 %v2768_v26  ;;  %v2850_v26 = vld [vmem:[#allocation2 + $0x288] ss:$16 sps:$4 sm:$0xff]  }
  0x69   :  { %1447 = vmatpush1.bf16.msra.mxu1 %v2769_v29  ;;  %v2856_v29 = vld [vmem:[#allocation2 + $0x2c8] ss:$16 sps:$4 sm:$0xff]  }
  0x6a   :  { %1365 = vmatpush1.bf16.msra.mxu0 %v2766_v28  ;;  %1448 = vmatprep.subr.bf16.mxu1 %v2777_v31  ;;  %v2858_v28 = vld [vmem:[#allocation2 + $0x2cc] ss:$16 sps:$4 sm:$0xff]   ;;  %v2937_v31 = vld [vmem:[%s3493_s3] ss:$8 sps:$4 sm:$0xff]  }
  0x6b   :  { %1366 = vmatprep.subr.bf16.mxu0 %v2774_v30  ;;  %v2861_v30 = vld [vmem:[#allocation2 + $0x2ec] ss:$16 sps:$4 sm:$0xff]  }
  0x6d   :  { %1449 = vmatpush1.bf16.msra.mxu1 %v2775_v35  ;;  %v2859_v35 = vld [vmem:[#allocation2 + $0x2e8] ss:$16 sps:$4 sm:$0xff]  }
  0x6e   :  { %1367 = vmatpush1.bf16.msra.mxu0 %v2772_v33  ;;  %1450 = vmatprep.subr.bf16.mxu1 %v2783_v37  ;;  %v2942_v33 = vld [vmem:[%s3493_s3 + $0x14] ss:$8 sps:$4 sm:$0xff]  }
  0x6f   :  { %1368 = vmatprep.subr.bf16.mxu0 %v2780_v36  ;;  %v2940_v36 = vld [vmem:[%s3493_s3 + $0x10] ss:$8 sps:$4 sm:$0xff]   ;;  %v2864_v37 = vld [vmem:[#allocation2 + $0x30c] ss:$16 sps:$4 sm:$0xff]  }
  0x71   :  { %1451 = vmatpush1.bf16.msra.mxu1 %v2781_v39  ;;  %v2862_v39 = vld [vmem:[#allocation2 + $0x308] ss:$16 sps:$4 sm:$0xff]  }
  0x72   :  { %1369 = vmatpush1.bf16.msra.mxu0 %v2778_v38  ;;  %1452 = vmatprep.subr.bf16.mxu1 %v2789_v41  ;;  %v2945_v38 = vld [vmem:[%s3493_s3 + $0x24] ss:$8 sps:$4 sm:$0xff]  }
  0x73   :  { %1370 = vmatprep.subr.bf16.mxu0 %v2786_v40  ;;  %v2943_v40 = vld [vmem:[%s3493_s3 + $0x20] ss:$8 sps:$4 sm:$0xff]   ;;  %v2867_v41 = vld [vmem:[#allocation2 + $0x32c] ss:$16 sps:$4 sm:$0xff]  }
  0x75   :  { %1453 = vmatpush1.bf16.msra.mxu1 %v2787_v43  ;;  %v2865_v43 = vld [vmem:[#allocation2 + $0x328] ss:$16 sps:$4 sm:$0xff]  }
  0x76   :  { %1371 = vmatpush1.bf16.msra.mxu0 %v2784_v42  ;;  %1454 = vmatprep.subr.bf16.mxu1 %v2795_v45  ;;  %v2948_v42 = vld [vmem:[%s3493_s3 + $0x34] ss:$8 sps:$4 sm:$0xff]  }
  0x77   :  { %1372 = vmatprep.subr.bf16.mxu0 %v2792_v44  ;;  %v2946_v44 = vld [vmem:[%s3493_s3 + $0x30] ss:$8 sps:$4 sm:$0xff]   ;;  %v2870_v45 = vld [vmem:[#allocation2 + $0x34c] ss:$16 sps:$4 sm:$0xff]  }
  0x79   :  { %1455 = vmatpush1.bf16.msra.mxu1 %v2793_v47  ;;  %v2868_v47 = vld [vmem:[#allocation2 + $0x348] ss:$16 sps:$4 sm:$0xff]  }
  0x7a   :  { %1373 = vmatpush1.bf16.msra.mxu0 %v2790_v46  ;;  %1456 = vmatprep.subr.bf16.mxu1 %v2801_v49  ;;  %v2951_v46 = vld [vmem:[%s3493_s3 + $0x44] ss:$8 sps:$4 sm:$0xff]  }
  0x7b   :  { %1374 = vmatprep.subr.bf16.mxu0 %v2798_v48  ;;  %v2949_v48 = vld [vmem:[%s3493_s3 + $0x40] ss:$8 sps:$4 sm:$0xff]   ;;  %v2873_v49 = vld [vmem:[#allocation2 + $0x36c] ss:$16 sps:$4 sm:$0xff]  }
  0x7d   :  { %1457 = vmatpush1.bf16.msra.mxu1 %v2799_v52  ;;  %v2871_v52 = vld [vmem:[#allocation2 + $0x368] ss:$16 sps:$4 sm:$0xff]  }
  0x7e   :  { %1375 = vmatpush1.bf16.msra.mxu0 %v2796_v50  ;;  %1458 = vmatprep.subr.bf16.mxu1 %v2807_v54  ;;  %v2954_v50 = vld [vmem:[%s3493_s3 + $0x54] ss:$8 sps:$4 sm:$0xff]  }
  0x7f   :  { %1376 = vmatprep.subr.bf16.mxu0 %v2804_v53  ;;  %v2952_v53 = vld [vmem:[%s3493_s3 + $0x50] ss:$8 sps:$4 sm:$0xff]   ;;  %v2876_v54 = vld [vmem:[#allocation2 + $0x38c] ss:$16 sps:$4 sm:$0xff]  }
  0x81   :  { %1459 = vmatpush1.bf16.msra.mxu1 %v2805_v56  ;;  %v2874_v56 = vld [vmem:[#allocation2 + $0x388] ss:$16 sps:$4 sm:$0xff]  }
  0x82   :  { %1377 = vmatpush1.bf16.msra.mxu0 %v2802_v55  ;;  %1460 = vmatprep.subr.bf16.mxu1 %v2813_v58  ;;  %v2957_v55 = vld [vmem:[%s3493_s3 + $0x64] ss:$8 sps:$4 sm:$0xff]  }
  0x83   :  { %1378 = vmatprep.subr.bf16.mxu0 %v2810_v57  ;;  %v2955_v57 = vld [vmem:[%s3493_s3 + $0x60] ss:$8 sps:$4 sm:$0xff]   ;;  %v2879_v58 = vld [vmem:[#allocation2 + $0x3ac] ss:$16 sps:$4 sm:$0xff]  }
  0x85   :  { %1461 = vmatpush1.bf16.msra.mxu1 %v2811_v60  ;;  %v2877_v60 = vld [vmem:[#allocation2 + $0x3a8] ss:$16 sps:$4 sm:$0xff]  }
  0x86   :  { %1379 = vmatpush1.bf16.msra.mxu0 %v2808_v59  ;;  %1462 = vmatprep.subr.bf16.mxu1 %v2819_v62  ;;  %v2960_v59 = vld [vmem:[%s3493_s3 + $0x74] ss:$8 sps:$4 sm:$0xff]  }
  0x87   :  { %1380 = vmatprep.subr.bf16.mxu0 %v2816_v61  ;;  %v2958_v61 = vld [vmem:[%s3493_s3 + $0x70] ss:$8 sps:$4 sm:$0xff]   ;;  %v2882_v62 = vld [vmem:[#allocation2 + $0x3cc] ss:$16 sps:$4 sm:$0xff]  }
  0x89   :  { %1463 = vmatpush1.bf16.msra.mxu1 %v2817_v0  ;;  %v2880_v0 = vld [vmem:[#allocation2 + $0x3c8] ss:$16 sps:$4 sm:$0xff]  }
  0x8a   :  { %1381 = vmatpush1.bf16.msra.mxu0 %v2814_v63  ;;  %1464 = vmatprep.subr.bf16.mxu1 %v2825_v2  ;;  %v2963_v63 = vld [vmem:[%s3493_s3 + $0x84] ss:$8 sps:$4 sm:$0xff]  }
  0x8b   :  { %1382 = vmatprep.subr.bf16.mxu0 %v2822_v1  ;;  %v2961_v1 = vld [vmem:[%s3493_s3 + $0x80] ss:$8 sps:$4 sm:$0xff]   ;;  %v2885_v2 = vld [vmem:[#allocation2 + $0x3ec] ss:$16 sps:$4 sm:$0xff]  }
  0x8d   :  { %1465 = vmatpush1.bf16.msra.mxu1 %v2823_v4  ;;  %v2883_v4 = vld [vmem:[#allocation2 + $0x3e8] ss:$16 sps:$4 sm:$0xff]  }
  0x8e   :  { %1383 = vmatpush1.bf16.msra.mxu0 %v2820_v3  ;;  %1466 = vmatprep.subr.bf16.mxu1 %v2831_v8  ;;  %v2966_v3 = vld [vmem:[%s3493_s3 + $0x94] ss:$8 sps:$4 sm:$0xff]  }
  0x8f   :  { %1384 = vmatprep.subr.bf16.mxu0 %v2828_v5  ;;  %v2964_v5 = vld [vmem:[%s3493_s3 + $0x90] ss:$8 sps:$4 sm:$0xff]   ;;  %v2888_v8 = vld [vmem:[#allocation2 + $0x40c] ss:$16 sps:$4 sm:$0xff]  }
  0x91   :  { %1467 = vmatpush1.bf16.msra.mxu1 %v2829_v10  ;;  %v2886_v10 = vld [vmem:[#allocation2 + $0x408] ss:$16 sps:$4 sm:$0xff]  }
  0x92   :  { %1385 = vmatpush1.bf16.msra.mxu0 %v2826_v9  ;;  %1477 = vmatprep.subr.bf16.mxu1 %v2836_v11  ;;  %v2969_v9 = vld [vmem:[%s3493_s3 + $0xa4] ss:$8 sps:$4 sm:$0xff]  }
  0x93   :  { %1395 = vmatprep.subr.bf16.mxu0 %v2842_v12  ;;  %v2891_v11 = vld [vmem:[#allocation2 + $0x42c] ss:$16 sps:$4 sm:$0xff]   ;;  %v2967_v12 = vld [vmem:[%s3493_s3 + $0xa0] ss:$8 sps:$4 sm:$0xff]  }
  0x94   :  { %1469 = vmatmul.mubr.bf16.vlgmr.msra.gmra.mrb[4].mxu1 %v3170_v6  ;;  %v2931_v6 = vld [vmem:[#allocation2 + $0x608] ss:$16 sps:$4 sm:$0xff]  }
  0x95   :  { %1387 = vmatmul.mubr.bf16.vlgmr.msra.gmra.mrb[0].mxu0 %v3189_v13  ;;  %1478 = vmatpush1.bf16.msra.mxu1 %v2834_v14  ;;  %v2972_v14 = vld [vmem:[%s3493_s3 + $0xb4] ss:$8 sps:$4 sm:$0xff]  }
  0x96   :  { %1396 = vmatpush1.bf16.msra.mxu0 %v2840_v15  ;;  %1479 = vmatprep.subr.bf16.mxu1 %v2839_v16  ;;  %v2889_v15 = vld [vmem:[#allocation2 + $0x428] ss:$16 sps:$4 sm:$0xff]   ;;  %v2894_v16 = vld [vmem:[#allocation2 + $0x44c] ss:$16 sps:$4 sm:$0xff]  }
  0x97   :  { %1427 = vmatprep.mubr.bf16.mxu0 %v3104_v20  ;;  %1509 = vmatprep.mubr.bf16.mxu1 %v3166_v51  ;;  %v2853_v51 = vld [vmem:[#allocation2 + $0x2a8] ss:$16 sps:$4 sm:$0xff]  }
  0x98   :  { %1559 = vmatprep.subr.bf16.mxu0 %v2933_v17  ;;  %v2970_v17 = vld [vmem:[%s3493_s3 + $0xb0] ss:$8 sps:$4 sm:$0xff]  }
  0x99   :  { %1480 = vmatpush1.bf16.msra.mxu1 %v2837_v18  ;;  %v2975_v18 = vld [vmem:[%s3493_s3 + $0xc4] ss:$8 sps:$4 sm:$0xff]  }
  0x9a   :  { %1481 = vmatprep.subr.bf16.mxu1 %v2845_v19  ;;  %v2892_v19 = vld [vmem:[#allocation2 + $0x448] ss:$16 sps:$4 sm:$0xff]  }
  0x9d   :  { %1482 = vmatpush1.bf16.msra.mxu1 %v2843_v21  ;;  %v2895_v21 = vld [vmem:[#allocation2 + $0x468] ss:$16 sps:$4 sm:$0xff]  }
  0x9e   :  { %1483 = vmatprep.subr.bf16.mxu1 %v2849_v22  ;;  %v2900_v22 = vld [vmem:[#allocation2 + $0x48c] ss:$16 sps:$4 sm:$0xff]  }
  0xa1   :  { %2496 = vmatmul.mubr.msk.bf16.vlgmr.msra.gmra.mrb[0].mxu0 %vm1268_vm0, %v2846_v23  ;;  %1484 = vmatpush1.bf16.msra.mxu1 %v2847_v24  ;;  %v2898_v24 = vld [vmem:[#allocation2 + $0x488] ss:$16 sps:$4 sm:$0xff]  }
  0xa2   :  { %1560 = vmatpush1.bf16.msra.mxu0 %v2931_v6  ;;  %1485 = vmatprep.subr.bf16.mxu1 %v2852_v25  ;;  %v2903_v6 = vld [vmem:[#allocation2 + $0x4ac] ss:$16 sps:$4 sm:$0xff]   ;;  %v2901_v25 = vld [vmem:[#allocation2 + $0x4a8] ss:$16 sps:$4 sm:$0xff]  }
  0xa3   :  { %1591 = vmatprep.mubr.bf16.mxu0 %v3104_v20  ;;  %2004 = vmatprep.subr.bf16.mxu0 %v2939_v32  ;;  %v2978_v20 = vld [vmem:[%s3493_s3 + $0xd4] ss:$8 sps:$4 sm:$0xff]   ;;  %v2981_v32 = vld [vmem:[%s3493_s3 + $0xe4] ss:$8 sps:$4 sm:$0xff]  }
  0xa5   :  { %1486 = vmatpush1.bf16.msra.mxu1 %v2850_v26  ;;  %v2906_v26 = vld [vmem:[#allocation2 + $0x4cc] ss:$16 sps:$4 sm:$0xff]  }
  0xa6   :  { %1487 = vmatprep.subr.bf16.mxu1 %v2855_v27  ;;  %v2904_v27 = vld [vmem:[#allocation2 + $0x4c8] ss:$16 sps:$4 sm:$0xff]  }
  0xa9   :  { %2497 = vmatmul.mubr.msk.bf16.vlgmr.msra.gmra.mrb[4].mxu0 %vm1268_vm0, %v2846_v23  ;;  %1488 = vmatpush1.bf16.msra.mxu1 %v2853_v51  ;;  %v2976_v23 = vld [vmem:[%s3493_s3 + $0xd0] ss:$8 sps:$4 sm:$0xff]   ;;  %v2909_v51 = vld [vmem:[#allocation2 + $0x4ec] ss:$16 sps:$4 sm:$0xff]  }
  0xaa   :  { %1489 = vmatprep.subr.bf16.mxu1 %v2858_v28  ;;  %2005 = vmatpush1.bf16.msra.mxu0 %v2937_v31  ;;  %v2907_v28 = vld [vmem:[#allocation2 + $0x4e8] ss:$16 sps:$4 sm:$0xff]   ;;  %v2915_v31 = vld [vmem:[#allocation2 + $0x52c] ss:$16 sps:$4 sm:$0xff]  }
  0xab   :  { %2006 = vmatprep.subr.bf16.mxu0 %v2942_v33  ;;  %v2979_v33 = vld [vmem:[%s3493_s3 + $0xe0] ss:$8 sps:$4 sm:$0xff]  }
  0xad   :  { %1490 = vmatpush1.bf16.msra.mxu1 %v2856_v29  ;;  %v2912_v29 = vld [vmem:[#allocation2 + $0x50c] ss:$16 sps:$4 sm:$0xff]  }
  0xae   :  { %1491 = vmatprep.subr.bf16.mxu1 %v2861_v30  ;;  %2007 = vmatpush1.bf16.msra.mxu0 %v2940_v36  ;;  %v2910_v30 = vld [vmem:[#allocation2 + $0x508] ss:$16 sps:$4 sm:$0xff]   ;;  %v2918_v36 = vld [vmem:[#allocation2 + $0x54c] ss:$16 sps:$4 sm:$0xff]  }
  0xaf   :  { %2008 = vmatprep.subr.bf16.mxu0 %v2945_v38  ;;  %v2982_v38 = vld [vmem:[%s3493_s3 + $0xf0] ss:$8 sps:$4 sm:$0xff]  }
  0xb1   :  { %1492 = vmatpush1.bf16.msra.mxu1 %v2859_v35  ;;  %v2913_v35 = vld [vmem:[#allocation2 + $0x528] ss:$16 sps:$4 sm:$0xff]  }
  0xb2   :  { %1493 = vmatprep.subr.bf16.mxu1 %v2864_v37  ;;  %2009 = vmatpush1.bf16.msra.mxu0 %v2943_v40  ;;  %v2984_v37 = vld [vmem:[%s3493_s3 + $0xf4] ss:$8 sps:$4 sm:$0xff]  }
  0xb3   :  { %2010 = vmatprep.subr.bf16.mxu0 %v2948_v42  ;;  %v2921_v40 = vld [vmem:[#allocation2 + $0x56c] ss:$16 sps:$4 sm:$0xff]   ;;  %v2919_v42 = vld [vmem:[#allocation2 + $0x568] ss:$16 sps:$4 sm:$0xff]  }
  0xb5   :  { %1494 = vmatpush1.bf16.msra.mxu1 %v2862_v39  ;;  %v2916_v39 = vld [vmem:[#allocation2 + $0x548] ss:$16 sps:$4 sm:$0xff]  }
  0xb6   :  { %1495 = vmatprep.subr.bf16.mxu1 %v2867_v41  ;;  %2011 = vmatpush1.bf16.msra.mxu0 %v2946_v44  ;;  %v2987_v41 = vld [vmem:[%s3493_s3 + $0x104] ss:$8 sps:$4 sm:$0xff]   ;;  %v2922_v44 = vld [vmem:[#allocation2 + $0x588] ss:$16 sps:$4 sm:$0xff]  }
  0xb7   :  { %2012 = vmatprep.subr.bf16.mxu0 %v2951_v46  ;;  %v2925_v46 = vld [vmem:[#allocation2 + $0x5a8] ss:$16 sps:$4 sm:$0xff]  }
  0xb9   :  { %1496 = vmatpush1.bf16.msra.mxu1 %v2865_v43  ;;  %v2924_v43 = vld [vmem:[#allocation2 + $0x58c] ss:$16 sps:$4 sm:$0xff]  }
  0xba   :  { %1497 = vmatprep.subr.bf16.mxu1 %v2870_v45  ;;  %2013 = vmatpush1.bf16.msra.mxu0 %v2949_v48  ;;  %v2927_v45 = vld [vmem:[#allocation2 + $0x5ac] ss:$16 sps:$4 sm:$0xff]   ;;  %v2928_v48 = vld [vmem:[#allocation2 + $0x5c8] ss:$16 sps:$4 sm:$0xff]  }
  0xbb   :  { %2014 = vmatprep.subr.bf16.mxu0 %v2954_v50  ;;  %v2934_v50 = vld [vmem:[#allocation2 + $0x5e8] ss:$16 sps:$4 sm:$0xff]  }
  0xbd   :  { %1498 = vmatpush1.bf16.msra.mxu1 %v2868_v47  ;;  %v2930_v47 = vld [vmem:[#allocation2 + $0x5cc] ss:$16 sps:$4 sm:$0xff]  }
  0xbe   :  { %1499 = vmatprep.subr.bf16.mxu1 %v2873_v49  ;;  %2015 = vmatpush1.bf16.msra.mxu0 %v2952_v53  ;;  %v2936_v49 = vld [vmem:[#allocation2 + $0x5ec] ss:$16 sps:$4 sm:$0xff]  }
  0xbf   :  { %2016 = vmatprep.subr.bf16.mxu0 %v2957_v55 }
  0xc1   :  { %1500 = vmatpush1.bf16.msra.mxu1 %v2871_v52 }
  0xc2   :  { %1501 = vmatprep.subr.bf16.mxu1 %v2876_v54  ;;  %2017 = vmatpush1.bf16.msra.mxu0 %v2955_v57 }
  0xc3   :  { %2018 = vmatprep.subr.bf16.mxu0 %v2960_v59  ;;  %v3305_v59 = vld [vmem:[%s3492_s2] sm:$0xf] }
  0xc5   :  { %1502 = vmatpush1.bf16.msra.mxu1 %v2874_v56  ;;  %v244_v56 = vlaneseq }
  0xc6   :  { %1503 = vmatprep.subr.bf16.mxu1 %v2879_v58  ;;  %2019 = vmatpush1.bf16.msra.mxu0 %v2958_v61 }
  0xc7   :  { %2020 = vmatprep.subr.bf16.mxu0 %v2963_v63  ;;  %v3299_v57 = vshrl.u32 %v244_v56, 7  ;;  %v3033_v63 = vld [vmem:[%s3495_s5 + $0x40] sm:$0xff]   ;;  %v3032_v56 = vld [vmem:[%s3493_s3 + $0x1f4] ss:$8 sps:$4 sm:$0xff]  }
  0xc9   :  { %1504 = vmatpush1.bf16.msra.mxu1 %v2877_v60  ;;  %v246_v58 = vsub.s32 0, %v3299_v57  ;;  %v250_v60 = vsub.s32 1, %v3299_v57 }
  0xca   :  { %1505 = vmatprep.subr.bf16.mxu1 %v2882_v62  ;;  %2021 = vmatpush1.bf16.msra.mxu0 %v2961_v1  ;;  %v3035_v1 = vld [vmem:[%s3495_s5 + $0x48] sm:$0xff]  }
  0xcb   :  { %2022 = vmatprep.subr.bf16.mxu0 %v2966_v3  ;;  %v251_v61 = vrot.slane %v3305_v59, %v250_v60 }
  0xcd   :  { %1506 = vmatpush1.bf16.msra.mxu1 %v2880_v0  ;;  %v3034_v0 = vld [vmem:[%s3495_s5] sm:$0xff]  }
  0xce   :  { %1507 = vmatprep.subr.bf16.mxu1 %v2885_v2  ;;  %2023 = vmatpush1.bf16.msra.mxu0 %v2964_v5 }
  0xcf   :  { %2024 = vmatprep.subr.bf16.mxu0 %v2969_v9 }
  0xd1   :  { %1508 = vmatpush1.bf16.msra.mxu1 %v2883_v4 }
  0xd2   :  { %1518 = vmatprep.subr.bf16.mxu1 %v2888_v8  ;;  %2025 = vmatpush1.bf16.msra.mxu0 %v2967_v12 }
  0xd3   :  { %2026 = vmatprep.subr.bf16.mxu0 %v2972_v14  ;;  %v3037_v14 = vld [vmem:[%s3495_s5 + $0x50] sm:$0xff]  }
  0xd4   :  { %1510 = vmatmul.mubr.bf16.vlgmr.msra.gmra.mrb[4].mxu1 %v3172_v7  ;;  %v2897_v7 = vld [vmem:[#allocation2 + $0x46c] ss:$16 sps:$4 sm:$0xff]  }
  0xd5   :  { %1519 = vmatpush1.bf16.msra.mxu1 %v2886_v10  ;;  %1550 = vmatprep.mubr.bf16.mxu1 %v3184_v34  ;;  %v2973_v34 = vld [vmem:[%s3493_s3 + $0xc0] ss:$8 sps:$4 sm:$0xff]  }
  0xd6   :  { %1520 = vmatprep.subr.bf16.mxu1 %v2891_v11  ;;  %2027 = vmatpush1.bf16.msra.mxu0 %v2970_v17  ;;  %v3036_v10 = vld [vmem:[%s3495_s5 + $0x8] sm:$0xff]  }
  0xd7   :  { %2028 = vmatprep.subr.bf16.mxu0 %v2975_v18  ;;  %v2985_v17 = vld [vmem:[%s3493_s3 + $0x100] ss:$8 sps:$4 sm:$0xff]   ;;  %v3038_v18 = vld [vmem:[%s3495_s5 + $0x10] sm:$0xff]  }
  0xd9   :  { %1521 = vmatpush1.bf16.msra.mxu1 %v2889_v15 }
  0xda   :  { %1522 = vmatprep.subr.bf16.mxu1 %v2894_v16  ;;  %2029 = vmatpush1.bf16.msra.mxu0 %v2973_v34  ;;  %v3039_v34 = vld [vmem:[%s3495_s5 + $0x58] sm:$0xff]  }
  0xdb   :  { %2030 = vmatprep.subr.bf16.mxu0 %v2978_v20 }
  0xdd   :  { %1523 = vmatpush1.bf16.msra.mxu1 %v2892_v19 }
  0xde   :  { %1524 = vmatprep.subr.bf16.mxu1 %v2897_v7  ;;  %2031 = vmatpush1.bf16.msra.mxu0 %v2976_v23  ;;  %v2990_v7 = vld [vmem:[%s3493_s3 + $0x114] ss:$8 sps:$4 sm:$0xff]  }
  0xdf   :  { %2032 = vmatprep.subr.bf16.mxu0 %v2981_v32  ;;  %v2999_v32 = vld [vmem:[%s3493_s3 + $0x144] ss:$8 sps:$4 sm:$0xff]  }
  0xe1   :  { %1525 = vmatpush1.bf16.msra.mxu1 %v2895_v21 }
  0xe2   :  { %1526 = vmatprep.subr.bf16.mxu1 %v2900_v22  ;;  %2033 = vmatpush1.bf16.msra.mxu0 %v2979_v33  ;;  %v2988_v22 = vld [vmem:[%s3493_s3 + $0x110] ss:$8 sps:$4 sm:$0xff]   ;;  %v2997_v33 = vld [vmem:[%s3493_s3 + $0x140] ss:$8 sps:$4 sm:$0xff]  }
  0xe3   :  { %2034 = vmatprep.subr.bf16.mxu0 %v2984_v37  ;;  %v3005_v37 = vld [vmem:[%s3493_s3 + $0x164] ss:$8 sps:$4 sm:$0xff]  }
  0xe5   :  { %1527 = vmatpush1.bf16.msra.mxu1 %v2898_v24  ;;  %v3040_v24 = vld [vmem:[%s3495_s5 + $0x18] sm:$0xff]  }
  0xe6   :  { %1528 = vmatprep.subr.bf16.mxu1 %v2903_v6  ;;  %2035 = vmatpush1.bf16.msra.mxu0 %v2982_v38  ;;  %v2993_v6 = vld [vmem:[%s3493_s3 + $0x124] ss:$8 sps:$4 sm:$0xff]   ;;  %v3003_v38 = vld [vmem:[%s3493_s3 + $0x160] ss:$8 sps:$4 sm:$0xff]  }
  0xe7   :  { %2045 = vmatprep.subr.bf16.mxu0 %v2987_v41  ;;  %v3011_v41 = vld [vmem:[%s3493_s3 + $0x184] ss:$8 sps:$4 sm:$0xff]  }
  0xe9   :  { %1529 = vmatpush1.bf16.msra.mxu1 %v2901_v25 }
  0xea   :  { %1530 = vmatprep.subr.bf16.mxu1 %v2906_v26  ;;  %v3041_v26 = vld [vmem:[%s3495_s5 + $0x60] sm:$0xff]  }
  0xed   :  { %1531 = vmatpush1.bf16.msra.mxu1 %v2904_v27  ;;  %v2991_v27 = vld [vmem:[%s3493_s3 + $0x120] ss:$8 sps:$4 sm:$0xff]  }
  0xee   :  { %1532 = vmatprep.subr.bf16.mxu1 %v2909_v51  ;;  %v3042_v51 = vld [vmem:[%s3495_s5 + $0x20] sm:$0xff]  }
  0xf1   :  { %1533 = vmatpush1.bf16.msra.mxu1 %v2907_v28  ;;  %v2996_v28 = vld [vmem:[%s3493_s3 + $0x134] ss:$8 sps:$4 sm:$0xff]  }
  0xf2   :  { %1534 = vmatprep.subr.bf16.mxu1 %v2912_v29  ;;  %v3043_v29 = vld [vmem:[%s3495_s5 + $0x68] sm:$0xff]  }
  0xf5   :  { %1535 = vmatpush1.bf16.msra.mxu1 %v2910_v30  ;;  %v2994_v30 = vld [vmem:[%s3493_s3 + $0x130] ss:$8 sps:$4 sm:$0xff]  }
  0xf6   :  { %1536 = vmatprep.subr.bf16.mxu1 %v2915_v31  ;;  %v3044_v31 = vld [vmem:[%s3495_s5 + $0x28] sm:$0xff]  }
  0xf9   :  { %1537 = vmatpush1.bf16.msra.mxu1 %v2913_v35  ;;  %v3002_v35 = vld [vmem:[%s3493_s3 + $0x154] ss:$8 sps:$4 sm:$0xff]  }
  0xfa   :  { %1538 = vmatprep.subr.bf16.mxu1 %v2918_v36  ;;  %v3000_v36 = vld [vmem:[%s3493_s3 + $0x150] ss:$8 sps:$4 sm:$0xff]  }
  0xfd   :  { %1539 = vmatpush1.bf16.msra.mxu1 %v2916_v39  ;;  %v3008_v39 = vld [vmem:[%s3493_s3 + $0x174] ss:$8 sps:$4 sm:$0xff]  }
  0xfe   :  { %1540 = vmatprep.subr.bf16.mxu1 %v2921_v40  ;;  %v3006_v40 = vld [vmem:[%s3493_s3 + $0x170] ss:$8 sps:$4 sm:$0xff]  }
 0x101   :  { %1541 = vmatpush1.bf16.msra.mxu1 %v2919_v42  ;;  %v3009_v42 = vld [vmem:[%s3493_s3 + $0x180] ss:$8 sps:$4 sm:$0xff]  }
 0x102   :  { %1542 = vmatprep.subr.bf16.mxu1 %v2924_v43  ;;  %v3014_v43 = vld [vmem:[%s3493_s3 + $0x194] ss:$8 sps:$4 sm:$0xff]  }
 0x105   :  { %1543 = vmatpush1.bf16.msra.mxu1 %v2922_v44  ;;  %v3012_v44 = vld [vmem:[%s3493_s3 + $0x190] ss:$8 sps:$4 sm:$0xff]  }
 0x106   :  { %1544 = vmatprep.subr.bf16.mxu1 %v2927_v45  ;;  %v3017_v45 = vld [vmem:[%s3493_s3 + $0x1a4] ss:$8 sps:$4 sm:$0xff]  }
 0x109   :  { %1545 = vmatpush1.bf16.msra.mxu1 %v2925_v46  ;;  %v3015_v46 = vld [vmem:[%s3493_s3 + $0x1a0] ss:$8 sps:$4 sm:$0xff]  }
 0x10a   :  { %1546 = vmatprep.subr.bf16.mxu1 %v2930_v47  ;;  %v3020_v47 = vld [vmem:[%s3493_s3 + $0x1b4] ss:$8 sps:$4 sm:$0xff]  }
 0x10d   :  { %1547 = vmatpush1.bf16.msra.mxu1 %v2928_v48  ;;  %v3018_v48 = vld [vmem:[%s3493_s3 + $0x1b0] ss:$8 sps:$4 sm:$0xff]  }
 0x10e   :  { %1548 = vmatprep.subr.bf16.mxu1 %v2936_v49  ;;  %v3023_v49 = vld [vmem:[%s3493_s3 + $0x1c4] ss:$8 sps:$4 sm:$0xff]  }
 0x111   :  { %1549 = vmatpush1.bf16.msra.mxu1 %v2934_v50  ;;  %v3021_v50 = vld [vmem:[%s3493_s3 + $0x1c0] ss:$8 sps:$4 sm:$0xff]  }
 0x112   :  { %2579 = vmatprep.subr.bf16.mxu1 %v3033_v63 }
 0x114   :  { %1551 = vmatmul.mubr.bf16.vlgmr.msra.gmra.mrb[4].mxu1 %v3189_v13  ;;  %v247_v13 = vrot.slane %v3305_v59, %v246_v58 }
 0x115   :  { %2580 = vmatpush3.bf16.msra.mxu1 %v3034_v0 }
 0x116   :  { %2581 = vmatprep.subr.bf16.mxu1 %v3035_v1 }
 0x119   :  { %2582 = vmatpush3.bf16.msra.mxu1 %v3036_v10 }
 0x11a   :  { %2583 = vmatprep.subr.bf16.mxu1 %v3037_v14 }
 0x11d   :  { %2584 = vmatpush3.bf16.msra.mxu1 %v3038_v18  ;;  %v3048_v18 = vld [vmem:[%s3495_s5 + $0x38] sm:$0xff]  }
 0x11e   :  { %2585 = vmatprep.subr.bf16.mxu1 %v3039_v34 }
 0x121   :  { %2586 = vmatpush3.bf16.msra.mxu1 %v3040_v24 }
 0x122   :  { %2587 = vmatprep.subr.bf16.mxu1 %v3041_v26 }
 0x125   :  { %2588 = vmatpush3.bf16.msra.mxu1 %v3042_v51 }
 0x126   :  { %2589 = vmatprep.subr.bf16.mxu1 %v3043_v29 }
 0x127   :  { %v1306_v52 = vpop.f32.mrb[0].mxu1 }
 0x128   :  { %v1308_v53 = vpop.f32.mrb[1].mxu1  ;;  %v1307_v62 = vadd.f32 %v1306_v52, %v247_v13  ;;  %v3026_v52 = vld [vmem:[%s3493_s3 + $0x1d4] ss:$8 sps:$4 sm:$0xff]   ;;  %v3030_v13 = vld [vmem:[%s3493_s3 + $0x1f0] ss:$8 sps:$4 sm:$0xff]  }
 0x129   :  { %v1310_v54 = vpop.f32.mrb[2].mxu1  ;;  %v1309_v2 = vadd.f32 %v1308_v53, %v251_v61  ;;  %2590 = vmatpush3.bf16.msra.mxu1 %v3044_v31  ;;  %v3024_v53 = vld [vmem:[%s3493_s3 + $0x1d0] ss:$8 sps:$4 sm:$0xff]   ;;  %v254_v61 = vsub.s32 2, %v3299_v57 }
 0x12a   :  { %v1311_v55 = vpop.f32.mrb[3].mxu1  ;;  %v3029_v54 = vld [vmem:[%s3493_s3 + $0x1e4] ss:$8 sps:$4 sm:$0xff]  }
 0x12b   :  { %v3027_v55 = vld [vmem:[%s3493_s3 + $0x1e0] ss:$8 sps:$4 sm:$0xff]   ;;  %v255_v63 = vrot.slane %v3305_v59, %v254_v61 }
 0x174   :  { %v1429_v3 = vpop.f32.mrb[0].mxu0 }
 0x175   :  { %v2602_v4 = vadd.f32 %v1429_v3, %v1307_v62  ;;  %v1431_v5 = vpop.f32.mrb[1].mxu0  ;;  %v258_v62 = vsub.s32 3, %v3299_v57 }
 0x176   :  { %v2604_v8 = vadd.f32 %v1431_v5, %v1309_v2  ;;  %v1433_v9 = vpop.f32.mrb[2].mxu0 }
 0x177   :  { %v1600_v11 = vmax.f32 %v2602_v4, 0.0  ;;  %v1434_v12 = vpop.f32.mrb[3].mxu0  ;;  %v259_v0 = vrot.slane %v3305_v59, %v258_v62  ;;  %v3045_v59 = vld [vmem:[%s3495_s5 + $0x70] sm:$0xff]  }
 0x178   :  { %v1601_v15 = vmax.f32 %v2604_v8, 0.0  ;;  %2591 = vmatprep.subr.bf16.mxu1 %v3045_v59 }
 0x179   :  { %v1604_v19 = vpack.c.bf16 %v1600_v11, %v1600_v11 }
 0x17a   :  { %v1605_v16 = vpack.c.bf16 %v1601_v15, %v1601_v15 }
 0x17c   :  { %2036 = vmatprep.mubr.bf16.mxu0 %v1605_v16  ;;  %v3341_v20 = vpop.f32.mrb[4].mxu0  ;;  %v3046_v16 = vld [vmem:[%s3495_s5 + $0x30] sm:$0xff]  }
 0x17d   :  { %2037 = vmatmul.mubr.bf16.vlgmr.msra.gmra.mrb[8].mxu0 %v1604_v19  ;;  %v3343_v21 = vpop.f32.mrb[5].mxu0  ;;  %2592 = vmatpush3.bf16.msra.mxu1 %v3046_v16  ;;  %v1672_v19 = vld [vmem:[%s3494_s4] sm:$0x3] }
 0x17e   :  { %2046 = vmatpush1.bf16.msra.mxu0 %v2985_v17  ;;  %v1597_v23 = vpop.f32.mrb[6].mxu0  ;;  %v3047_v17 = vld [vmem:[%s3495_s5 + $0x78] sm:$0xff]   ;;  %v1681_v34 = vrot.slane %v1672_v19, %v250_v60 }
 0x17f   :  { %2047 = vmatprep.subr.bf16.mxu0 %v2990_v7  ;;  %v1598_v25 = vpop.f32.mrb[7].mxu0  ;;  %2593 = vmatprep.subr.bf16.mxu1 %v3047_v17  ;;  %v1677_v7 = vrot.slane %v1672_v19, %v246_v58  ;;  %v2562_v58 = vld [vmem:[%s3496_s6] ss:$0 sm:$0xff]  ;;  %s2284_s6 = sshll.u32 %s3105_s30, 4  ;;  %s2285_s6 = int_to_ptr.vmem [resolvable:$true] %s2284_s6 }
 0x180   :  { %s3075_s8 = scalar_lea.vmem %s2285_s6, 128  ;;  %p3080_p9 = scmp.lt.s32.totalorder %s2285_s6, %s2285_s6 }
 0x181   :  { %2594 = vmatpush3.bf16.msra.mxu1 %v3048_v18  ;;  %p3076_p8 = scmp.ne.s32.totalorder %s2285_s6, %s3075_s8  ;;  %p3081_p10 = scmp.lt.s32.totalorder %s3075_s8, %s3075_s8 }
 0x182   :  { %2048 = vmatpush1.bf16.msra.mxu0 %v2988_v22 }
 0x183   :  { %2049 = vmatprep.subr.bf16.mxu0 %v2993_v6  ;;  %p3082_p11 = por %p3081_p10, %p3080_p9 }
 0x185   :  { %p3083_p12 = pnand %p3082_p11, %p3076_p8 }
 0x186   :  { %2050 = vmatpush1.bf16.msra.mxu0 %v2991_v27 }
 0x187   :  { %2051 = vmatprep.subr.bf16.mxu0 %v2996_v28 }
 0x18a   :  { %2052 = vmatpush1.bf16.msra.mxu0 %v2994_v30 }
 0x18b   :  { %2053 = vmatprep.subr.bf16.mxu0 %v2999_v32 }
 0x18e   :  { %2054 = vmatpush1.bf16.msra.mxu0 %v2997_v33 }
 0x18f   :  { %2055 = vmatprep.subr.bf16.mxu0 %v3002_v35 }
 0x192   :  { %2056 = vmatpush1.bf16.msra.mxu0 %v3000_v36 }
 0x193   :  { %2057 = vmatprep.subr.bf16.mxu0 %v3005_v37 }
 0x196   :  { %2058 = vmatpush1.bf16.msra.mxu0 %v3003_v38 }
 0x197   :  { %2059 = vmatprep.subr.bf16.mxu0 %v3008_v39 }
 0x19a   :  { %2060 = vmatpush1.bf16.msra.mxu0 %v3006_v40 }
 0x19b   :  { %2061 = vmatprep.subr.bf16.mxu0 %v3011_v41 }
 0x19e   :  { %2062 = vmatpush1.bf16.msra.mxu0 %v3009_v42 }
 0x19f   :  { %2063 = vmatprep.subr.bf16.mxu0 %v3014_v43 }
 0x1a2   :  { %2064 = vmatpush1.bf16.msra.mxu0 %v3012_v44 }
 0x1a3   :  { %2065 = vmatprep.subr.bf16.mxu0 %v3017_v45 }
 0x1a6   :  { %2066 = vmatpush1.bf16.msra.mxu0 %v3015_v46 }
 0x1a7   :  { %2067 = vmatprep.subr.bf16.mxu0 %v3020_v47 }
 0x1aa   :  { %2068 = vmatpush1.bf16.msra.mxu0 %v3018_v48 }
 0x1ab   :  { %2069 = vmatprep.subr.bf16.mxu0 %v3023_v49 }
 0x1ae   :  { %2070 = vmatpush1.bf16.msra.mxu0 %v3021_v50 }
 0x1af   :  { %2071 = vmatprep.subr.bf16.mxu0 %v3026_v52 }
 0x1b2   :  { %2072 = vmatpush1.bf16.msra.mxu0 %v3024_v53 }
 0x1b3   :  { %2073 = vmatprep.subr.bf16.mxu0 %v3029_v54 }
 0x1b6   :  { %2074 = vmatpush1.bf16.msra.mxu0 %v3027_v55 }
 0x1b7   :  { %2075 = vmatprep.subr.bf16.mxu0 %v3032_v56 }
 0x1ba   :  { %2076 = vmatpush1.bf16.msra.mxu0 %v3030_v13 }
 0x1e7   :  { %v1552_v1 = vpop.f32.mrb[4].mxu1 }
 0x1e8   :  { %v2605_v2 = vadd.f32 %v1552_v1, %v255_v63  ;;  %v1554_v3 = vpop.f32.mrb[5].mxu1 }
 0x1e9   :  { %v2607_v4 = vadd.f32 %v1554_v3, %v259_v0  ;;  %v1556_v5 = vpop.f32.mrb[6].mxu1 }
 0x1ea   :  { %v2606_v8 = vadd.f32 %v2605_v2, %v3341_v20  ;;  %v1557_v9 = vpop.f32.mrb[7].mxu1 }
 0x1eb   :  { %v2608_v10 = vadd.f32 %v2607_v4, %v3343_v21 }
 0x1ec   :  { %v1602_v11 = vmax.f32 %v2606_v8, 0.0 }
 0x1ed   :  { %v1603_v12 = vmax.f32 %v2608_v10, 0.0 }
 0x1ee   :  { %v1606_v15 = vpack.c.bf16 %v1602_v11, %v1602_v11 }
 0x1ef   :  { %v1607_v14 = vpack.c.bf16 %v1603_v12, %v1603_v12 }
 0x1f1   :  { %2077 = vmatprep.mubr.bf16.mxu0 %v1607_v14 }
 0x1f2   :  { %2078 = vmatmul.mubr.bf16.vlgmr.msra.gmra.mrb[8].mxu0 %v1606_v15 }
 0x2c5   :  { %v2079_v20 = vpop.f32.mrb[8].mxu0 }
 0x2c6   :  { %v2609_v21 = vadd.f32 %v2079_v20, %v1677_v7  ;;  %v2081_v22 = vpop.f32.mrb[9].mxu0 }
 0x2c7   :  { %v2610_v23 = vadd.f32 %v2081_v22, %v1681_v34  ;;  %v2083_v24 = vpop.f32.mrb[10].mxu0 }
 0x2c8   :  { %v2086_v6 = vmax.f32 %v2609_v21, 0.0  ;;  %v2084_v25 = vpop.f32.mrb[11].mxu0 }
 0x2c9   :  { %v2087_v26 = vmax.f32 %v2610_v23, 0.0 }
 0x2ca   :  { %v2088_v51 = vpack.c.bf16 %v2086_v6, %v2086_v6 }
 0x2cb   :  { %v2089_v27 = vpack.c.bf16 %v2087_v26, %v2087_v26 }
 0x2cd   :  { %2257 = vmatprep.mubr.bf16.mxu1 %v2089_v27 }
 0x2ce   :  { %2258 = vmatmul.mubr.bf16.vlgmr.msra.gmra.mrb[8].mxu1 %v2088_v51 }
 0x3a1   :  { %v2595_v28 = vpop.f32.mrb[8].mxu1 }
 0x3a2   :  { %v2596_v29 = vpop.f32.mrb[9].mxu1 }
 0x3a3   :  { %v2597_v57 = vadd.f32 %v2596_v29, %v2595_v28  ;;  %v2598_v60 = vpop.f32.mrb[10].mxu1 }
 0x3a4   :  { %v2599_v30 = vpop.f32.mrb[11].mxu1 }
 0x3a5   :  { %v2260_v31 = vadd.f32 %v2597_v57, %v2562_v58 }
 0x3a7   :  { %v2266_v32 = vsel %vm2265_vm1, %v2260_v31, -inf }
 0x3a8   :  { %2267 = vmax.xlane.f32.xlu0 %v2266_v32 }
 0x435   :  { %v2268_v33 = vpop.xlane.xlu0 %2267 }
 0x436   :  { %v2269_v35 = vsub.f32 %v2260_v31, %v2268_v33 }
 0x438   :  { %v2270_v36 = vmul.f32 1.442695, %v2269_v35 }
 0x43a   :  { %3049 = vpow2.f32 %v2270_v36 }
 0x444   :  { %v3050_v37 = vpop.eup %3049 }
 0x445   :  { %v2272_v38 = vsel %vm2265_vm1, %v3050_v37, 0.0 }
 0x446   :  { %2273 = vadd.xlane.f32.xlu0 %v2272_v38 }
 0x4d3   :  { %v2274_v39 = vpop.xlane.xlu0 %2273 }
 0x4d4   :  { %3051 = vrcp.f32 %v2274_v39 }
 0x4de   :  { %v3052_v40 = vpop.eup %3051 }
 0x4df   :  { %v2276_v41 = vmul.f32 %v3052_v40, %v3050_v37 }
 0x4e1   :  { %2277 = vst.msk [vmem:[#allocation5] sm:$0xff] %vm2265_vm1, %v2276_v41 }
 0x4e2   :  { %3086 = shalt.err (!%p3083_p12)
}
 0x4e3   :  { %s3087_s11 = scalar_lea.hbm %s3497_s7, 128 }
 0x4e4   :  { %p3088_p13 = scmp.ne.s32.totalorder %s3497_s7, %s3087_s11  ;;  %p3091_p0 = scmp.lt.u32.totalorder %s3087_s11, %s3497_s7 }
 0x4e6   :  { %p3093_p1 = pnand %p3091_p0, %p3088_p13 }
 0x4e8   :  { %3096 = shalt.err (!%p3093_p1)
}
 0x4e9   :  { %2287 = dma.vmem_to_hbm [thread:$0]  %s2285_s6, 128, %s3497_s7, [#allocation4]  }
 0x4ea   :  { %3099 = dma.done.wait [#allocation4], 128  }
 0x4eb   :  { %3100 = vsyncadd [#allocation4], 4294967168 }
 0x4ec   :  { %2291 = vsyncpa [#allocation3], 1 }
 0x4ed   :  { %2292 = vsyncpa [#allocation4], 1 }

</bundles_post_ra>
